<compile_context>
chip_gen: v6e
topology: v6e:2x2x1
jax: 0.10.0
libtpu: 0.0.40
codegen_flags: <defaults>
</compile_context>

<pallas_src>
import jax
import jax.numpy as jnp
from jax.experimental import pallas as pl
from jax.experimental.pallas import tpu as pltpu

LANE = 128
BF16_SUBLANE = 16   # bf16 packs 16 sublanes per vreg


def _round_up(n, m):
    return (n + m - 1) // m * m


def _choose_tile_b(n_batch):
    """Grid-aware batch tile: big tiles for throughput, >=2 steps for megacore."""
    if n_batch <= BF16_SUBLANE:
        return BF16_SUBLANE
    target = pl.cdiv(n_batch, 8)                 # aim for ~8 grid steps
    return max(BF16_SUBLANE, min(512, _round_up(target, BF16_SUBLANE)))


# ----------------------------------------------------------------------------
# Kernel: fused 4-layer MLP (BN pre-folded, dropout = identity).
#   x_ref:   (TILE_B, Fp)   bf16   activations (narrow, zero-padded features)
#   w0_ref:  (Fp, P)        bf16   layer-1 weight (zero-padded)
#   w_ref:   (3, P, P)      bf16   layer 2..4 BN-folded weights (zero-padded)
#   b_ref:   (8, P)         f32    rows 0..3 = the 4 BN-folded biases
#   out_ref: (TILE_B, P)    bf16   lane-dense logits (cols >= num_classes are 0)
# ----------------------------------------------------------------------------
def mlp_kernel(x_ref, w0_ref, w_ref, b_ref, out_ref):
    b = b_ref[...]
    z = jnp.dot(x_ref[...], w0_ref[...], preferred_element_type=jnp.float32)
    h = jnp.maximum(z + b[0:1, :], 0.0).astype(jnp.bfloat16)
    for layer in (1, 2):
        z = jnp.dot(h, w_ref[layer - 1], preferred_element_type=jnp.float32)
        h = jnp.maximum(z + b[layer:layer + 1, :], 0.0).astype(jnp.bfloat16)
    out = jnp.dot(h, w_ref[2], preferred_element_type=jnp.float32)
    out_ref[...] = (out + b[3:4, :]).astype(jnp.bfloat16)


# ----------------------------------------------------------------------------
# Wrapper
# ----------------------------------------------------------------------------
def neural_net_forward(x, packed):
    """x: [B, input_size] float32. packed: output of prepare_params()."""
    W0, W, B = packed["W0"], packed["W"], packed["B"]
    num_classes = packed["num_classes"]
    n_batch, in_features = x.shape
    in_feat_pad, P = W0.shape

    tile_b = _choose_tile_b(n_batch)
    b_pad = _round_up(n_batch, tile_b)
    grid = (b_pad // tile_b,)

    # Single fused pad of the bf16 cast (no zeros+dynamic-update-slice round trip),
    # and x stays only in_feat_pad lanes wide.
    x_p = jnp.pad(x.astype(jnp.bfloat16),
                  ((0, b_pad - n_batch), (0, in_feat_pad - in_features)))

    flops = 2 * b_pad * (in_feat_pad * P + 3 * P * P)
    bytes_accessed = (x_p.size * 2 + W0.size * 2 + W.size * 2
                      + B.size * 4 + b_pad * P * 2)

    out = pl.pallas_call(
        mlp_kernel,
        out_shape=jax.ShapeDtypeStruct((b_pad, P), jnp.bfloat16),
        grid=grid,
        in_specs=[
            pl.BlockSpec((tile_b, in_feat_pad), lambda i: (i, 0)),  # x: batch-tiled
            pl.BlockSpec((in_feat_pad, P), lambda i: (0, 0)),       # W0: resident
            pl.BlockSpec((3, P, P), lambda i: (0, 0, 0)),           # W2..4: resident
            pl.BlockSpec((8, P), lambda i: (0, 0)),                 # biases: resident
        ],
        out_specs=pl.BlockSpec((tile_b, P), lambda i: (i, 0)),
        compiler_params=pltpu.CompilerParams(
            dimension_semantics=("parallel",),
        ),
        cost_estimate=pl.CostEstimate(
            flops=flops, transcendentals=0, bytes_accessed=bytes_accessed),
    )(x_p, W0, W, B)
    return out[:n_batch, :num_classes].astype(jnp.float32)


# ----------------------------------------------------------------------------
# Parameter creation (PyTorch-layout) and prep (BN fold + pad + pack)
# ----------------------------------------------------------------------------
def make_params(key, input_size, h1, h2, h3, num_classes):
    """Deterministic synthetic params. Linear weights stored as [in, out]."""
    dims = [(input_size, h1), (h1, h2), (h2, h3), (h3, num_classes)]
    keys = iter(jax.random.split(key, 4 * 2 + 3 * 4))
    p = {}
    for i, (fi, fo) in enumerate(dims, start=1):
        bound = 1.0 / jnp.sqrt(fi)
        p[f"w{i}"] = jax.random.uniform(next(keys), (fi, fo), jnp.float32, -bound, bound)
        p[f"b{i}"] = jax.random.uniform(next(keys), (fo,), jnp.float32, -bound, bound)
    for i, feat in enumerate([h1, h2, h3], start=1):
        p[f"gamma{i}"] = 1.0 + 0.1 * jax.random.normal(next(keys), (feat,), jnp.float32)
        p[f"beta{i}"] = 0.1 * jax.random.normal(next(keys), (feat,), jnp.float32)
        p[f"mean{i}"] = 0.1 * jax.random.normal(next(keys), (feat,), jnp.float32)
        p[f"var{i}"] = 1.0 + 0.05 * jax.random.uniform(next(keys), (feat,), jnp.float32)
    return p


def prepare_params(p, eps=1e-5):
    """Fold BN (eval) affines into the following Linear, pad, pack."""
    w = [p["w1"], p["w2"], p["w3"], p["w4"]]
    b = [p["b1"], p["b2"], p["b3"], p["b4"]]

    def bn_affine(i):
        scale = p[f"gamma{i}"] / jnp.sqrt(p[f"var{i}"] + eps)
        shift = p[f"beta{i}"] - p[f"mean{i}"] * scale
        return scale, shift

    # (relu*s + t) @ W + b  ==  relu @ (s[:,None]*W) + (t @ W + b)   (exact, f32)
    for i in (1, 2, 3):
        s, t = bn_affine(i)
        b[i] = b[i] + t @ w[i]          # uses the ORIGINAL w[i]
        w[i] = s[:, None] * w[i]

    input_size = w[0].shape[0]
    in_feat_pad = _round_up(input_size, BF16_SUBLANE)
    P = _round_up(max(wi.shape[1] for wi in w), LANE)

    W0 = jnp.zeros((in_feat_pad, P), jnp.float32)
    W0 = W0.at[:input_size, :w[0].shape[1]].set(w[0])

    W = jnp.zeros((3, P, P), jnp.float32)
    B = jnp.zeros((8, P), jnp.float32)
    B = B.at[0, :b[0].shape[0]].set(b[0])
    for i in (1, 2, 3):
        fi, fo = w[i].shape
        W = W.at[i - 1, :fi, :fo].set(w[i])
        B = B.at[i, :fo].set(b[i])

    return {
        "W0": W0.astype(jnp.bfloat16),   # MXU-native operands (f32 accumulation)
        "W": W.astype(jnp.bfloat16),
        "B": B,                          # epilogue stays f32
        "num_classes": w[3].shape[1],
    }


# ----------------------------------------------------------------------------
# References
# ----------------------------------------------------------------------------
def reference_packed(x, packed):
    """Mirrors the kernel's arithmetic exactly (bf16 operands/output, f32 accum)."""
    W0, W, B = packed["W0"], packed["W"], packed["B"]
    n, f = x.shape
    fp = W0.shape[0]
    h = jnp.zeros((n, fp), jnp.bfloat16).at[:, :f].set(x.astype(jnp.bfloat16))
    z = jnp.dot(h, W0, preferred_element_type=jnp.float32) + B[0]
    h = jnp.maximum(z, 0.0).astype(jnp.bfloat16)
    for i in (1, 2):
        z = jnp.dot(h, W[i - 1], preferred_element_type=jnp.float32) + B[i]
        h = jnp.maximum(z, 0.0).astype(jnp.bfloat16)
    out = jnp.dot(h, W[2], preferred_element_type=jnp.float32) + B[3]
    out = out.astype(jnp.bfloat16).astype(jnp.float32)
    return out[:, :packed["num_classes"]]


def reference_torch_semantics(x, p, eps=1e-5):
    """Pure-f32 eval-mode forward matching the PyTorch module (dropout = identity)."""
    def bn(h, i):
        scale = p[f"gamma{i}"] / jnp.sqrt(p[f"var{i}"] + eps)
        return (h - p[f"mean{i}"]) * scale + p[f"beta{i}"]
    h = bn(jnp.maximum(x @ p["w1"] + p["b1"], 0.0), 1)
    h = bn(jnp.maximum(h @ p["w2"] + p["b2"], 0.0), 2)
    h = bn(jnp.maximum(h @ p["w3"] + p["b3"], 0.0), 3)
    return h @ p["w4"] + p["b4"]


if __name__ == "__main__":
    input_size, h1, h2, h3, num_classes = 32, 64, 48, 32, 8
    batch = 8

    key = jax.random.PRNGKey(0)
    kx, kp = jax.random.split(key)
    x = jax.random.normal(kx, (batch, input_size), jnp.float32)

    raw = make_params(kp, input_size, h1, h2, h3, num_classes)
    packed = prepare_params(raw)

    out = jax.block_until_ready(neural_net_forward(x, packed))
    assert out.shape == (batch, num_classes)

    # 1) Exact-arithmetic check (same bf16-operand / f32-accum / bf16-output math
    #    as the kernel).
    ref_exact = reference_packed(x, packed)
    assert jnp.allclose(out, ref_exact, atol=2e-3, rtol=2e-3), "mismatch vs packed ref"

    # 2) Semantic check vs. the original f32 eval-mode forward
    #    (loose tolerance covers bf16 operand/output rounding).
    ref_f32 = reference_torch_semantics(x, raw)
    assert jnp.allclose(out, ref_f32, atol=5e-2, rtol=5e-2), "mismatch vs f32 semantics"

    print("KERNEL_OK")
</pallas_src>

<mosaic_0001>
module attributes {stable_mosaic.version = 11 : i64} {
  func.func @mlp_kernel(%arg0: i32, %arg1: memref<16x32xbf16, #tpu.memory_space<vmem>>, %arg2: memref<32x128xbf16, #tpu.memory_space<vmem>>, %arg3: memref<3x128x128xbf16, #tpu.memory_space<vmem>>, %arg4: memref<8x128xf32, #tpu.memory_space<vmem>>, %arg5: memref<16x128xbf16, #tpu.memory_space<vmem>>) attributes {dimension_semantics = [#tpu.dimension_semantics<parallel>], iteration_bounds = array<i64: 1>, scalar_prefetch = 0 : i64, scratch_operands = 0 : i64, tpu.core_type = #tpu.core_type<tc>, window_params = [{transform_indices = @transform_0, window_bounds = array<i64: 16, 32>}, {pipeline_mode = #tpu.pipeline_mode<synchronous>, transform_indices = @transform_1, window_bounds = array<i64: 32, 128>}, {pipeline_mode = #tpu.pipeline_mode<synchronous>, transform_indices = @transform_2, window_bounds = array<i64: 3, 128, 128>}, {pipeline_mode = #tpu.pipeline_mode<synchronous>, transform_indices = @transform_3, window_bounds = array<i64: 8, 128>}, {transform_indices = @transform_4, window_bounds = array<i64: 16, 128>}]} {
    %c0 = arith.constant 0 : index
    %c0_0 = arith.constant 0 : index
    %0 = vector.load %arg4[%c0, %c0_0] : memref<8x128xf32, #tpu.memory_space<vmem>>, vector<8x128xf32>
    %c0_1 = arith.constant 0 : index
    %c0_2 = arith.constant 0 : index
    %1 = vector.load %arg1[%c0_1, %c0_2] : memref<16x32xbf16, #tpu.memory_space<vmem>>, vector<16x32xbf16>
    %c0_3 = arith.constant 0 : index
    %c0_4 = arith.constant 0 : index
    %2 = vector.load %arg2[%c0_3, %c0_4] : memref<32x128xbf16, #tpu.memory_space<vmem>>, vector<32x128xbf16>
    %cst = arith.constant dense<0.000000e+00> : vector<16x128xf32>
    %3 = tpu.matmul %1, %2, %cst {dimension_numbers = #tpu.dot_dimension_numbers<[1], [0], [0], [1], [0, 0, 1, 1], [], []>} : vector<16x32xbf16>, vector<32x128xbf16>, vector<16x128xf32> -> vector<16x128xf32>
    %4 = vector.extract_strided_slice %0 {offsets = [0, 0], sizes = [1, 128], strides = [1, 1]} : vector<8x128xf32> to vector<1x128xf32>
    %5 = vector.broadcast %4 : vector<1x128xf32> to vector<16x128xf32>
    %6 = arith.addf %3, %5 : vector<16x128xf32>
    %cst_5 = arith.constant 0.000000e+00 : f32
    %7 = vector.broadcast %cst_5 : f32 to vector<16x128xf32>
    %8 = arith.maximumf %6, %7 : vector<16x128xf32>
    %9 = arith.truncf %8 : vector<16x128xf32> to vector<16x128xbf16>
    %c0_6 = arith.constant 0 : index
    %c0_7 = arith.constant 0 : index
    %c0_8 = arith.constant 0 : index
    %10 = vector.load %arg3[%c0_6, %c0_7, %c0_8] : memref<3x128x128xbf16, #tpu.memory_space<vmem>>, vector<1x128x128xbf16>
    %11 = vector.shape_cast %10 : vector<1x128x128xbf16> to vector<128x128xbf16>
    %cst_9 = arith.constant dense<0.000000e+00> : vector<16x128xf32>
    %12 = tpu.matmul %9, %11, %cst_9 {dimension_numbers = #tpu.dot_dimension_numbers<[1], [0], [0], [1], [0, 0, 1, 1], [], []>} : vector<16x128xbf16>, vector<128x128xbf16>, vector<16x128xf32> -> vector<16x128xf32>
    %13 = vector.extract_strided_slice %0 {offsets = [1, 0], sizes = [1, 128], strides = [1, 1]} : vector<8x128xf32> to vector<1x128xf32>
    %14 = vector.broadcast %13 : vector<1x128xf32> to vector<16x128xf32>
    %15 = arith.addf %12, %14 : vector<16x128xf32>
    %cst_10 = arith.constant 0.000000e+00 : f32
    %16 = vector.broadcast %cst_10 : f32 to vector<16x128xf32>
    %17 = arith.maximumf %15, %16 : vector<16x128xf32>
    %18 = arith.truncf %17 : vector<16x128xf32> to vector<16x128xbf16>
    %c1 = arith.constant 1 : index
    %c0_11 = arith.constant 0 : index
    %c0_12 = arith.constant 0 : index
    %19 = vector.load %arg3[%c1, %c0_11, %c0_12] : memref<3x128x128xbf16, #tpu.memory_space<vmem>>, vector<1x128x128xbf16>
    %20 = vector.shape_cast %19 : vector<1x128x128xbf16> to vector<128x128xbf16>
    %cst_13 = arith.constant dense<0.000000e+00> : vector<16x128xf32>
    %21 = tpu.matmul %18, %20, %cst_13 {dimension_numbers = #tpu.dot_dimension_numbers<[1], [0], [0], [1], [0, 0, 1, 1], [], []>} : vector<16x128xbf16>, vector<128x128xbf16>, vector<16x128xf32> -> vector<16x128xf32>
    %22 = vector.extract_strided_slice %0 {offsets = [2, 0], sizes = [1, 128], strides = [1, 1]} : vector<8x128xf32> to vector<1x128xf32>
    %23 = vector.broadcast %22 : vector<1x128xf32> to vector<16x128xf32>
    %24 = arith.addf %21, %23 : vector<16x128xf32>
    %cst_14 = arith.constant 0.000000e+00 : f32
    %25 = vector.broadcast %cst_14 : f32 to vector<16x128xf32>
    %26 = arith.maximumf %24, %25 : vector<16x128xf32>
    %27 = arith.truncf %26 : vector<16x128xf32> to vector<16x128xbf16>
    %c2 = arith.constant 2 : index
    %c0_15 = arith.constant 0 : index
    %c0_16 = arith.constant 0 : index
    %28 = vector.load %arg3[%c2, %c0_15, %c0_16] : memref<3x128x128xbf16, #tpu.memory_space<vmem>>, vector<1x128x128xbf16>
    %29 = vector.shape_cast %28 : vector<1x128x128xbf16> to vector<128x128xbf16>
    %cst_17 = arith.constant dense<0.000000e+00> : vector<16x128xf32>
    %30 = tpu.matmul %27, %29, %cst_17 {dimension_numbers = #tpu.dot_dimension_numbers<[1], [0], [0], [1], [0, 0, 1, 1], [], []>} : vector<16x128xbf16>, vector<128x128xbf16>, vector<16x128xf32> -> vector<16x128xf32>
    %31 = vector.extract_strided_slice %0 {offsets = [3, 0], sizes = [1, 128], strides = [1, 1]} : vector<8x128xf32> to vector<1x128xf32>
    %32 = vector.broadcast %31 : vector<1x128xf32> to vector<16x128xf32>
    %33 = arith.addf %30, %32 : vector<16x128xf32>
    %34 = arith.truncf %33 : vector<16x128xf32> to vector<16x128xbf16>
    %c0_18 = arith.constant 0 : index
    %c0_19 = arith.constant 0 : index
    %35 = vector.load %arg5[%c0_18, %c0_19] : memref<16x128xbf16, #tpu.memory_space<vmem>>, vector<16x128xbf16>
    tpu.vector_store %arg5[%c0_18, %c0_19], %34 {strides = array<i32>} : memref<16x128xbf16, #tpu.memory_space<vmem>>, vector<16x128xbf16>,
    return
  }
  func.func @transform_0(%arg0: i32) -> (i32, i32) {
    %c0_i32 = arith.constant 0 : i32
    %c0_i32_0 = arith.constant 0 : i32
    return %arg0, %c0_i32 : i32, i32
  }
  func.func @transform_1(%arg0: i32) -> (i32, i32) {
    %c0_i32 = arith.constant 0 : i32
    %c0_i32_0 = arith.constant 0 : i32
    %c0_i32_1 = arith.constant 0 : i32
    return %c0_i32, %c0_i32_0 : i32, i32
  }
  func.func @transform_2(%arg0: i32) -> (i32, i32, i32) {
    %c0_i32 = arith.constant 0 : i32
    %c0_i32_0 = arith.constant 0 : i32
    %c0_i32_1 = arith.constant 0 : i32
    %c0_i32_2 = arith.constant 0 : i32
    return %c0_i32, %c0_i32_0, %c0_i32_1 : i32, i32, i32
  }
  func.func @transform_3(%arg0: i32) -> (i32, i32) {
    %c0_i32 = arith.constant 0 : i32
    %c0_i32_0 = arith.constant 0 : i32
    %c0_i32_1 = arith.constant 0 : i32
    return %c0_i32, %c0_i32_0 : i32, i32
  }
  func.func @transform_4(%arg0: i32) -> (i32, i32) {
    %c0_i32 = arith.constant 0 : i32
    %c0_i32_0 = arith.constant 0 : i32
    return %arg0, %c0_i32 : i32, i32
  }
}

</mosaic_0001>

<bundles_post_ra>
// kernel: tpu_custom_call.1
= control target key start
LH: loop header
LB: loop body
LE: loop exit
PB: predicated region body
PF: predicated region fallthrough
CT: control target
= control target key end

     0   :  { %9 = vsyncpa [#allocation3], 0  ;;  %s898_s0 = inlined_call_operand.hbm [shape: bf16[16,32], index: 0, kind: input, shape index: {}]   ;;  %s899_s1 = inlined_call_operand.hbm [shape: bf16[32,128], index: 1, kind: input, shape index: {}]   ;;  %s900_s2 = inlined_call_operand.hbm [shape: bf16[3,128,128], index: 2, kind: input, shape index: {}]   ;;  %s901_s3 = inlined_call_operand.hbm [shape: f32[8,128], index: 3, kind: input, shape index: {}]   ;;  %s902_s4 = inlined_call_operand.hbm [shape: bf16[16,128], index: 4, kind: output, shape index: {}]  }
   0x1   :  { %10 = vsyncpa [#allocation6], 0 }
   0x2   :  { %11 = vsyncpa [#allocation9], 0 }
   0x3   :  { %12 = vsyncpa [#allocation4], 0  ;;  %s791_s15 = smov [#allocation5]   ;;  %s792_s17 = smov [#allocation2]  }
   0x4   :  { %s30_s16 = sshll.u32 %s791_s15, 4  ;;  %s18_s18 = sshll.u32 %s792_s17, 4  ;;  %s31_s16 = int_to_ptr.vmem [resolvable:$true] %s30_s16  ;;  %s19_s18 = int_to_ptr.vmem [resolvable:$true] %s18_s18 }
   0x5   :  { %s691_s19 = scalar_lea.vmem %s31_s16, 256  ;;  %p696_p1 = scmp.lt.s32.totalorder %s31_s16, %s31_s16 }
   0x6   :  { %p692_p0 = scmp.ne.s32.totalorder %s31_s16, %s691_s19  ;;  %p697_p2 = scmp.lt.s32.totalorder %s691_s19, %s691_s19 }
   0x8   :  { %p698_p3 = por %p697_p2, %p696_p1 }
   0xa   :  { %p699_p4 = pnand %p698_p3, %p692_p0 }
   0xc   :  { %702 = shalt.err (!%p699_p4)
}
   0xd   :  { %s793_s20 = smov 64   ;;  %s794_s21 = smov 4  }
   0xe   :  { %36 = dma.hbm_to_vmem [thread:$0]  %s899_s1, 256, %s31_s16, [#allocation6], %s793_s20, %s793_s20, %s794_s21  }
   0xf   :  { %s711_s24 = scalar_lea.vmem %s19_s18, 128  ;;  %p716_p6 = scmp.lt.s32.totalorder %s19_s18, %s19_s18 }
  0x10   :  { %p712_p5 = scmp.ne.s32.totalorder %s19_s18, %s711_s24  ;;  %p717_p7 = scmp.lt.s32.totalorder %s711_s24, %s711_s24 }
  0x12   :  { %p718_p8 = por %p717_p7, %p716_p6 }
  0x14   :  { %p719_p9 = pnand %p718_p8, %p712_p5 }
  0x16   :  { %722 = shalt.err (!%p719_p9)
}
  0x17   :  { %24 = dma.hbm_to_vmem [thread:$0]  %s898_s0, 128, %s19_s18, [#allocation3], %s793_s20, %s793_s20, %s794_s21  }
  0x18   :  { %s795_s27 = smov [#allocation7]   ;;  %s796_s29 = smov [#allocation8]  }
  0x19   :  { %s42_s28 = sshll.u32 %s795_s27, 4  ;;  %s55_s30 = sshll.u32 %s796_s29, 4  ;;  %s43_s28 = int_to_ptr.vmem [resolvable:$true] %s42_s28  ;;  %s56_s30 = int_to_ptr.vmem [resolvable:$true] %s55_s30 }
  0x1a   :  { %s731_s1 = scalar_lea.vmem %s43_s28, 3072  ;;  %p736_p11 = scmp.lt.s32.totalorder %s43_s28, %s43_s28 }
  0x1b   :  { %p732_p10 = scmp.ne.s32.totalorder %s43_s28, %s731_s1  ;;  %p737_p12 = scmp.lt.s32.totalorder %s731_s1, %s731_s1 }
  0x1d   :  { %p738_p13 = por %p737_p12, %p736_p11 }
  0x1f   :  { %p739_p0 = pnand %p738_p13, %p732_p10 }
  0x21   :  { %742 = shalt.err (!%p739_p0)
}
  0x22   :  { %48 = dma.hbm_to_vmem [thread:$0]  %s900_s2, 3072, %s43_s28, [#allocation6], %s793_s20, %s793_s20, %s794_s21  }
  0x23   :  { %s751_s0 = scalar_lea.vmem %s56_s30, 128  ;;  %p756_p2 = scmp.lt.s32.totalorder %s56_s30, %s56_s30 }
  0x24   :  { %p752_p1 = scmp.ne.s32.totalorder %s56_s30, %s751_s0  ;;  %p757_p3 = scmp.lt.s32.totalorder %s751_s0, %s751_s0 }
  0x26   :  { %p758_p4 = por %p757_p3, %p756_p2 }
  0x28   :  { %p759_p5 = pnand %p758_p4, %p752_p1 }
  0x2a   :  { %762 = shalt.err (!%p759_p5)
}
  0x2b   :  { %58 = dma.hbm_to_vmem [thread:$0]  %s901_s3, 128, %s56_s30, [#allocation9]  }
  0x2c   :  { %783 = dma.done.wait [#allocation3], 128  }
  0x2d   :  { %784 = vsyncadd [#allocation3], 4294967168 }
  0x2e   :  { %785 = dma.done.wait [#allocation6], 3328  }
  0x2f   :  { %786 = vsyncadd [#allocation6], 4294963968 }
  0x30   :  { %787 = dma.done.wait [#allocation9], 128  }
  0x31   :  { %788 = vsyncadd [#allocation9], 4294967168  ;;  %v797_v0 = vmov 0.0   ;;  %vm798_vm0 = vmmov 0   ;;  %v656_v1 = vld [vmem:[#allocation5 + $0x8] sm:$0xff]   ;;  %v657_v2 = vld [vmem:[#allocation5] sm:$0xff]   ;;  %v79_v17 = vlaneseq }
  0x32   :  { %579 = vmatprep.subr.bf16.mxu0 %v797_v0  ;;  %583 = vmatprep.mubr.msk.bf16.mxu0 %vm798_vm0, %v797_v0  ;;  %v659_v3 = vld [vmem:[#allocation7 + $0x38] sm:$0xff]   ;;  %v658_v4 = vld [vmem:[#allocation2] sm:$0xff]   ;;  %v660_v5 = vld [vmem:[#allocation7 + $0x30] sm:$0xff]   ;;  %vm100_vm1 = vcmask 261120   ;;  %s799_s2 = smov [#allocation10]  }
  0x33   :  { %587 = vmatprep.subr.bf16.mxu1 %v797_v0  ;;  %603 = vmatprep.mubr.msk.bf16.mxu1 %vm798_vm0, %v797_v0  ;;  %v661_v6 = vld [vmem:[#allocation7 + $0x28] sm:$0xff]   ;;  %v662_v7 = vld [vmem:[#allocation7 + $0x20] sm:$0xff]   ;;  %v663_v8 = vld [vmem:[#allocation7 + $0x18] sm:$0xff]   ;;  %v869_v18 = vshrl.u32 %v79_v17, 7  ;;  %s498_s3 = sshll.u32 %s799_s2, 4  ;;  %s499_s3 = int_to_ptr.vmem [resolvable:$true] %s498_s3 }
  0x34   :  { %580 = vmatpush3.bf16.msra.mxu0 %v656_v1  ;;  %588 = vmatpush3.bf16.msra.mxu1 %v659_v3  ;;  %v664_v9 = vld [vmem:[#allocation7 + $0x10] sm:$0xff]   ;;  %v665_v10 = vld [vmem:[#allocation7 + $0x8] sm:$0xff]   ;;  %v666_v11 = vld [vmem:[#allocation7] sm:$0xff]   ;;  %s763_s9 = scalar_lea.vmem %s499_s3, 128  ;;  %p768_p7 = scmp.lt.s32.totalorder %s499_s3, %s499_s3 }
  0x35   :  { %581 = vmatprep.subr.bf16.mxu0 %v797_v0  ;;  %589 = vmatprep.subr.bf16.mxu1 %v797_v0  ;;  %v667_v12 = vld [vmem:[#allocation7 + $0x78] sm:$0xff]   ;;  %v668_v13 = vld [vmem:[#allocation7 + $0x70] sm:$0xff]   ;;  %v669_v14 = vld [vmem:[#allocation7 + $0x68] sm:$0xff]   ;;  %v81_v19 = vsub.s32 0, %v869_v18  ;;  %v166_v39 = vsub.s32 1, %v869_v18  ;;  %v279_v53 = vsub.s32 2, %v869_v18  ;;  %p764_p6 = scmp.ne.s32.totalorder %s499_s3, %s763_s9  ;;  %p769_p8 = scmp.lt.s32.totalorder %s763_s9, %s763_s9 }
  0x36   :  { %v670_v15 = vld [vmem:[#allocation7 + $0x60] sm:$0xff]   ;;  %v671_v16 = vld [vmem:[#allocation7 + $0x58] sm:$0xff]   ;;  %v672_v31 = vld [vmem:[#allocation7 + $0x50] sm:$0xff]   ;;  %v392_v1 = vsub.s32 3, %v869_v18 }
  0x37   :  { %v872_v20 = vld [vmem:[#allocation8] sm:$0xff]  ;;  %v673_v32 = vld [vmem:[#allocation7 + $0x48] sm:$0xff]   ;;  %v675_v34 = vld [vmem:[#allocation7 + $0xb8] sm:$0xff]   ;;  %p770_p9 = por %p769_p8, %p768_p7 }
  0x38   :  { %582 = vmatpush3.bf16.msra.mxu0 %v657_v2  ;;  %590 = vmatpush3.bf16.msra.mxu1 %v660_v5  ;;  %v82_v21 = vrot.slane %v872_v20, %v81_v19  ;;  %v674_v33 = vld [vmem:[#allocation7 + $0x40] sm:$0xff]   ;;  %v676_v35 = vld [vmem:[#allocation7 + $0xb0] sm:$0xff]   ;;  %v677_v36 = vld [vmem:[#allocation7 + $0xa8] sm:$0xff]   ;;  %v167_v40 = vrot.slane %v872_v20, %v166_v39  ;;  %v280_v54 = vrot.slane %v872_v20, %v279_v53 }
  0x39   :  { %607 = vmatprep.subr.bf16.mxu0 %v797_v0  ;;  %591 = vmatprep.subr.bf16.mxu1 %v797_v0  ;;  %v678_v37 = vld [vmem:[#allocation7 + $0xa0] sm:$0xff]   ;;  %v679_v38 = vld [vmem:[#allocation7 + $0x98] sm:$0xff]   ;;  %v680_v50 = vld [vmem:[#allocation7 + $0x90] sm:$0xff]   ;;  %p771_p10 = pnand %p770_p9, %p764_p6 }
  0x3a   :  { %v681_v51 = vld [vmem:[#allocation7 + $0x88] sm:$0xff]   ;;  %v682_v52 = vld [vmem:[#allocation7 + $0x80] sm:$0xff]  }
  0x3b   :  { %584 = vmatmul.mubr.msk.bf16.vlgmr.msra.gmra.mxu0 %vm100_vm1, %v658_v4 }
  0x3c   :  { %623 = vmatprep.mubr.msk.bf16.mxu0 %vm798_vm0, %v797_v0  ;;  %592 = vmatpush3.bf16.msra.mxu1 %v661_v6 }
  0x3d   :  { %593 = vmatprep.subr.bf16.mxu1 %v797_v0  ;;  %608 = vmatpush3.bf16.msra.mxu0 %v667_v12 }
  0x3e   :  { %609 = vmatprep.subr.bf16.mxu0 %v797_v0 }
  0x40   :  { %594 = vmatpush3.bf16.msra.mxu1 %v662_v7 }
  0x41   :  { %595 = vmatprep.subr.bf16.mxu1 %v797_v0  ;;  %610 = vmatpush3.bf16.msra.mxu0 %v668_v13 }
  0x42   :  { %611 = vmatprep.subr.bf16.mxu0 %v797_v0 }
  0x44   :  { %596 = vmatpush3.bf16.msra.mxu1 %v663_v8 }
  0x45   :  { %597 = vmatprep.subr.bf16.mxu1 %v797_v0  ;;  %612 = vmatpush3.bf16.msra.mxu0 %v669_v14 }
  0x46   :  { %613 = vmatprep.subr.bf16.mxu0 %v797_v0 }
  0x48   :  { %598 = vmatpush3.bf16.msra.mxu1 %v664_v9 }
  0x49   :  { %599 = vmatprep.subr.bf16.mxu1 %v797_v0  ;;  %614 = vmatpush3.bf16.msra.mxu0 %v670_v15 }
  0x4a   :  { %615 = vmatprep.subr.bf16.mxu0 %v797_v0 }
  0x4c   :  { %600 = vmatpush3.bf16.msra.mxu1 %v665_v10 }
  0x4d   :  { %601 = vmatprep.subr.bf16.mxu1 %v797_v0  ;;  %616 = vmatpush3.bf16.msra.mxu0 %v671_v16 }
  0x4e   :  { %617 = vmatprep.subr.bf16.mxu0 %v797_v0 }
  0x50   :  { %602 = vmatpush3.bf16.msra.mxu1 %v666_v11 }
  0x51   :  { %627 = vmatprep.subr.bf16.mxu1 %v797_v0  ;;  %618 = vmatpush3.bf16.msra.mxu0 %v672_v31 }
  0x52   :  { %619 = vmatprep.subr.bf16.mxu0 %v797_v0 }
  0x55   :  { %620 = vmatpush3.bf16.msra.mxu0 %v673_v32 }
  0x56   :  { %621 = vmatprep.subr.bf16.mxu0 %v797_v0 }
  0x59   :  { %622 = vmatpush3.bf16.msra.mxu0 %v674_v33 }
  0xfb   :  { %v138_v22 = vpop.f32.mrf.mxu0 }
  0xfc   :  { %v139_v24 = vadd.f32 %v138_v22, %v82_v21 }
  0xfd   :  { %v585_v23 = vpop.f32.mrf.mxu0 }
  0xfe   :  { %v145_v28 = vmax.f32 %v139_v24, 0.0 }
  0xff   :  { %v141_v25 = vpop.f32.mrf.mxu0 }
 0x100   :  { %v142_v26 = vadd.f32 %v141_v25, %v82_v21 }
 0x101   :  { %v586_v27 = vpop.f32.mrf.mxu0 }
 0x102   :  { %v146_v29 = vmax.f32 %v142_v26, 0.0 }
 0x104   :  { %v147_v30 = vpack.c.bf16 %v146_v29, %v145_v28 }
 0x106   :  { %604 = vmatmul.mubr.bf16.vlgmr.msra.gmra.mxu1 %v147_v30 }
 0x107   :  { %643 = vmatprep.mubr.msk.bf16.mxu1 %vm798_vm0, %v797_v0  ;;  %628 = vmatpush3.bf16.msra.mxu1 %v675_v34 }
 0x108   :  { %629 = vmatprep.subr.bf16.mxu1 %v797_v0 }
 0x10b   :  { %630 = vmatpush3.bf16.msra.mxu1 %v676_v35 }
 0x10c   :  { %631 = vmatprep.subr.bf16.mxu1 %v797_v0 }
 0x10f   :  { %632 = vmatpush3.bf16.msra.mxu1 %v677_v36 }
 0x110   :  { %633 = vmatprep.subr.bf16.mxu1 %v797_v0 }
 0x113   :  { %634 = vmatpush3.bf16.msra.mxu1 %v678_v37 }
 0x114   :  { %635 = vmatprep.subr.bf16.mxu1 %v797_v0 }
 0x117   :  { %636 = vmatpush3.bf16.msra.mxu1 %v679_v38 }
 0x118   :  { %637 = vmatprep.subr.bf16.mxu1 %v797_v0 }
 0x11b   :  { %638 = vmatpush3.bf16.msra.mxu1 %v680_v50 }
 0x11c   :  { %639 = vmatprep.subr.bf16.mxu1 %v797_v0 }
 0x11f   :  { %640 = vmatpush3.bf16.msra.mxu1 %v681_v51 }
 0x120   :  { %641 = vmatprep.subr.bf16.mxu1 %v797_v0  ;;  %v393_v0 = vrot.slane %v872_v20, %v392_v1 }
 0x123   :  { %642 = vmatpush3.bf16.msra.mxu1 %v682_v52 }
 0x1c6   :  { %v250_v41 = vpop.f32.mrf.mxu1 }
 0x1c7   :  { %v251_v43 = vadd.f32 %v250_v41, %v167_v40 }
 0x1c8   :  { %v605_v42 = vpop.f32.mrf.mxu1 }
 0x1c9   :  { %v257_v47 = vmax.f32 %v251_v43, 0.0 }
 0x1ca   :  { %v253_v44 = vpop.f32.mrf.mxu1 }
 0x1cb   :  { %v254_v45 = vadd.f32 %v253_v44, %v167_v40 }
 0x1cc   :  { %v606_v46 = vpop.f32.mrf.mxu1 }
 0x1cd   :  { %v258_v48 = vmax.f32 %v254_v45, 0.0 }
 0x1cf   :  { %v259_v49 = vpack.c.bf16 %v258_v48, %v257_v47 }
 0x1d1   :  { %624 = vmatmul.mubr.bf16.vlgmr.msra.gmra.mxu0 %v259_v49 }
 0x291   :  { %v363_v55 = vpop.f32.mrf.mxu0 }
 0x292   :  { %v364_v57 = vadd.f32 %v363_v55, %v280_v54 }
 0x293   :  { %v625_v56 = vpop.f32.mrf.mxu0 }
 0x294   :  { %v370_v61 = vmax.f32 %v364_v57, 0.0 }
 0x295   :  { %v366_v58 = vpop.f32.mrf.mxu0 }
 0x296   :  { %v367_v59 = vadd.f32 %v366_v58, %v280_v54 }
 0x297   :  { %v626_v60 = vpop.f32.mrf.mxu0 }
 0x298   :  { %v371_v62 = vmax.f32 %v367_v59, 0.0 }
 0x29a   :  { %v372_v63 = vpack.c.bf16 %v371_v62, %v370_v61 }
 0x29c   :  { %644 = vmatmul.mubr.bf16.vlgmr.msra.gmra.mxu1 %v372_v63 }
 0x35c   :  { %v476_v2 = vpop.f32.mrf.mxu1 }
 0x35d   :  { %v477_v5 = vadd.f32 %v476_v2, %v393_v0 }
 0x35e   :  { %v645_v3 = vpop.f32.mrf.mxu1 }
 0x360   :  { %v479_v4 = vpop.f32.mrf.mxu1 }
 0x361   :  { %v480_v6 = vadd.f32 %v479_v4, %v393_v0 }
 0x362   :  { %v646_v7 = vpop.f32.mrf.mxu1 }
 0x363   :  { %v547_v8 = vpack.c.bf16 %v480_v6, %v477_v5 }
 0x365   :  { %548 = vst [vmem:[#allocation10] sm:$0xff] %v547_v8  }
 0x366   :  { %774 = shalt.err (!%p771_p10)
}
 0x367   :  { %504 = dma.vmem_to_hbm [thread:$0]  %s499_s3, 128, %s902_s4, [#allocation4], %s793_s20, %s793_s20, %s794_s21  }
 0x368   :  { %789 = dma.done.wait [#allocation4], 128  }
 0x369   :  { %790 = vsyncadd [#allocation4], 4294967168 }
 0x36a   :  { %508 = vsyncpa [#allocation3], 1 }
 0x36b   :  { %509 = vsyncpa [#allocation6], 1 }
 0x36c   :  { %510 = vsyncpa [#allocation9], 1 }
 0x36d   :  { %511 = vsyncpa [#allocation4], 1 }

</bundles_post_ra>
